<compile_context>
chip_gen: v5e
topology: v5e:2x2
jax: 0.10.0
libtpu: 0.0.40
codegen_flags: <defaults>
</compile_context>

<pallas_src>
import functools

import jax
import jax.numpy as jnp
from jax.experimental import pallas as pl
from jax.experimental.pallas import tpu as pltpu

LRELU_SLOPE = 0.01   # nn.LeakyReLU() default negative_slope
LANE = 128
SUBLANE = 8


def _round_up(x, m):
    return ((x + m - 1) // m) * m


def _rdb_kernel(x_ref,
                w1_ref, b1_ref, w2_ref, b2_ref, w3_ref, b3_ref, w4_ref, b4_ref,
                w5_ref, b5_ref,
                o_ref):
    """One (batch, spatial-tile) block of the fused residual-dense block."""
    # x_ref: (c_mid, tile) -- channels on sublanes, pixels on lanes.
    x = x_ref[...].astype(jnp.float32)

    def res_step(x, w_ref, b_ref):
        # (c_mid, c_mid) @ (c_mid, tile) on the MXU: bf16 operands, f32 acc.
        y = jnp.dot(w_ref[...], x.astype(w_ref.dtype),
                    preferred_element_type=jnp.float32) + b_ref[...]
        y = jnp.where(y >= 0.0, y, LRELU_SLOPE * y)   # LeakyReLU
        return x + y                                   # residual

    x = res_step(x, w1_ref, b1_ref)
    x = res_step(x, w2_ref, b2_ref)
    x = res_step(x, w3_ref, b3_ref)
    x = res_step(x, w4_ref, b4_ref)

    y = jnp.dot(w5_ref[...], x.astype(w5_ref.dtype),
                preferred_element_type=jnp.float32) + b5_ref[...]
    o_ref[...] = y.astype(o_ref.dtype)   # lane-dense store (tile % 128 == 0)


@functools.partial(jax.jit, static_argnames=("tile_hw", "compute_dtype"))
def residual_dense_block_v2(x_nchw, params, *, tile_hw=8192,
                            compute_dtype=jnp.bfloat16):
    """NCHW entry point matching the PyTorch module (kernel_size=1)."""
    N, C, H, W = x_nchw.shape
    c_mid, c_in = params["w1"].shape
    c_out = params["w5"].shape[0]
    assert C == c_in == c_mid, \
        "residual adds require input channels == mid_channels (= max(32, output))"

    out_dtype = x_nchw.dtype
    HW = H * W

    # ---- spatial-tile selection (lane axis) --------------------------------
    # VMEM budget for the double-buffered f32 x and out tiles.
    budget = 12 * 1024 * 1024
    per_col_bytes = 4 * 2 * (c_mid + c_out)
    max_tile = max(LANE, (budget // per_col_bytes) // LANE * LANE)
    tile = min(tile_hw, max_tile, _round_up(HW, LANE))
    if N == 1:
        # keep >= 2 grid steps when possible so both v7x TensorCores get work
        tile = min(tile, max(LANE, _round_up((HW + 1) // 2, LANE)))
    tile = max(LANE, tile)
    hw_pad = _round_up(HW, tile)

    # contiguous reshape (free); pad spatial axis only if needed
    x3 = x_nchw.reshape(N, C, HW)
    if hw_pad != HW:
        x3 = jnp.pad(x3, ((0, 0), (0, 0), (0, hw_pad - HW)))

    # weights to bf16 once (tiny, grid-invariant); biases stay f32
    ws = [params[f"w{i}"].astype(compute_dtype) for i in range(1, 6)]
    bs = [params[f"b{i}"].astype(jnp.float32) for i in range(1, 6)]

    # ---- specs --------------------------------------------------------------
    x_spec = pl.BlockSpec((None, c_mid, tile), lambda n, j: (n, 0, j))
    out_spec = pl.BlockSpec((None, c_out, tile), lambda n, j: (n, 0, j))
    const = lambda shape: pl.BlockSpec(shape, lambda n, j: (0, 0))

    in_specs = [x_spec]
    for _ in range(4):
        in_specs += [const((c_mid, c_mid)), const((c_mid, 1))]
    in_specs += [const((c_out, c_mid)), const((c_out, 1))]

    grid = (N, hw_pad // tile)
    flops = 2 * N * hw_pad * c_mid * (4 * c_mid + c_out)
    bytes_accessed = (
        x3.size * x3.dtype.itemsize
        + sum(a.size * a.dtype.itemsize for a in ws + bs)
        + N * c_out * hw_pad * jnp.dtype(out_dtype).itemsize)

    out3 = pl.pallas_call(
        _rdb_kernel,
        out_shape=jax.ShapeDtypeStruct((N, c_out, hw_pad), out_dtype),
        grid_spec=pltpu.PrefetchScalarGridSpec(
            num_scalar_prefetch=0,
            grid=grid,
            in_specs=in_specs,
            out_specs=out_spec,
        ),
        compiler_params=pltpu.CompilerParams(
            dimension_semantics=("parallel", "parallel"),
            vmem_limit_bytes=32 * 1024 * 1024,
        ),
        cost_estimate=pl.CostEstimate(
            flops=flops, transcendentals=0, bytes_accessed=bytes_accessed),
    )(x3, ws[0], bs[0], ws[1], bs[1], ws[2], bs[2], ws[3], bs[3], ws[4], bs[4])

    if hw_pad != HW:
        out3 = out3[:, :, :HW]
    return out3.reshape(N, c_out, H, W)


def reference_forward(x_nchw, params, compute_dtype=jnp.bfloat16):
    """Plain-JAX reference mirroring the kernel's mixed-precision math."""
    N, C, H, W = x_nchw.shape
    c_out = params["w5"].shape[0]
    x = x_nchw.reshape(N, C, H * W).astype(jnp.float32)
    for i in range(1, 5):
        w = params[f"w{i}"].astype(compute_dtype)
        y = jnp.einsum("oc,ncs->nos", w, x.astype(compute_dtype),
                       preferred_element_type=jnp.float32)
        y = y + params[f"b{i}"].astype(jnp.float32)[None]
        y = jnp.where(y >= 0.0, y, LRELU_SLOPE * y)
        x = x + y
    w5 = params["w5"].astype(compute_dtype)
    y = jnp.einsum("oc,ncs->nos", w5, x.astype(compute_dtype),
                   preferred_element_type=jnp.float32)
    y = y + params["b5"].astype(jnp.float32)[None]
    return y.reshape(N, c_out, H, W).astype(x_nchw.dtype)


def init_params(key, c_in, c_out):
    """Synthetic init matching the module's parameter shapes.

    Weights are (C_out, C_in) (= PyTorch Conv2d 1x1 weight[:, :, 0, 0]);
    biases are (C_out, 1).
    NOTE: the original module zero-inits conv5 (mutil.initialize_weights 0.0);
    a small nonzero init is used here so the correctness check is non-trivial.
    """
    c_mid = max(32, c_out)
    keys = jax.random.split(key, 10)
    params = {}
    for i in range(1, 5):
        params[f"w{i}"] = 0.1 * jax.random.normal(
            keys[2 * (i - 1)], (c_mid, c_mid), jnp.float32)
        params[f"b{i}"] = 0.1 * jax.random.normal(
            keys[2 * (i - 1) + 1], (c_mid, 1), jnp.float32)
    params["w5"] = 0.02 * jax.random.normal(keys[8], (c_out, c_mid), jnp.float32)
    params["b5"] = 0.02 * jax.random.normal(keys[9], (c_out, 1), jnp.float32)
    return params


if __name__ == "__main__":
    key = jax.random.PRNGKey(0)
    k_x, k_p = jax.random.split(key)

    # input channels must equal mid_channels (= max(32, output)) for the
    # module's residual adds to be well-formed -> C_in = 32.
    N, C_IN, H, W = 2, 32, 16, 16
    C_OUT = 16

    x = jax.random.normal(k_x, (N, C_IN, H, W), jnp.float32)
    params = init_params(k_p, C_IN, C_OUT)

    out = jax.block_until_ready(residual_dense_block_v2(x, params))
    ref = reference_forward(x, params)

    assert out.shape == (N, C_OUT, H, W)
    max_err = float(jnp.max(jnp.abs(out - ref)))
    assert jnp.allclose(out, ref, atol=2e-3, rtol=2e-3), \
        f"mismatch vs reference (max abs err {max_err})"

    print("KERNEL_OK")
</pallas_src>

<mosaic_0001>
module attributes {stable_mosaic.version = 11 : i64} {
  func.func @_rdb_kernel(%arg0: i32, %arg1: i32, %arg2: memref<1x32x256xf32, #tpu.memory_space<vmem>>, %arg3: memref<32x32xbf16, #tpu.memory_space<vmem>>, %arg4: memref<32x1xf32, #tpu.memory_space<vmem>>, %arg5: memref<32x32xbf16, #tpu.memory_space<vmem>>, %arg6: memref<32x1xf32, #tpu.memory_space<vmem>>, %arg7: memref<32x32xbf16, #tpu.memory_space<vmem>>, %arg8: memref<32x1xf32, #tpu.memory_space<vmem>>, %arg9: memref<32x32xbf16, #tpu.memory_space<vmem>>, %arg10: memref<32x1xf32, #tpu.memory_space<vmem>>, %arg11: memref<16x32xbf16, #tpu.memory_space<vmem>>, %arg12: memref<16x1xf32, #tpu.memory_space<vmem>>, %arg13: memref<1x16x256xf32, #tpu.memory_space<vmem>>) attributes {dimension_semantics = [#tpu.dimension_semantics<parallel>, #tpu.dimension_semantics<parallel>], iteration_bounds = array<i64: 2, 1>, scalar_prefetch = 0 : i64, scratch_operands = 0 : i64, tpu.core_type = #tpu.core_type<tc>, window_params = [{transform_indices = @transform_0, window_bounds = array<i64: 1, 32, 256>}, {pipeline_mode = #tpu.pipeline_mode<synchronous>, transform_indices = @transform_1, window_bounds = array<i64: 32, 32>}, {pipeline_mode = #tpu.pipeline_mode<synchronous>, transform_indices = @transform_2, window_bounds = array<i64: 32, 1>}, {pipeline_mode = #tpu.pipeline_mode<synchronous>, transform_indices = @transform_3, window_bounds = array<i64: 32, 32>}, {pipeline_mode = #tpu.pipeline_mode<synchronous>, transform_indices = @transform_4, window_bounds = array<i64: 32, 1>}, {pipeline_mode = #tpu.pipeline_mode<synchronous>, transform_indices = @transform_5, window_bounds = array<i64: 32, 32>}, {pipeline_mode = #tpu.pipeline_mode<synchronous>, transform_indices = @transform_6, window_bounds = array<i64: 32, 1>}, {pipeline_mode = #tpu.pipeline_mode<synchronous>, transform_indices = @transform_7, window_bounds = array<i64: 32, 32>}, {pipeline_mode = #tpu.pipeline_mode<synchronous>, transform_indices = @transform_8, window_bounds = array<i64: 32, 1>}, {pipeline_mode = #tpu.pipeline_mode<synchronous>, transform_indices = @transform_9, window_bounds = array<i64: 16, 32>}, {pipeline_mode = #tpu.pipeline_mode<synchronous>, transform_indices = @transform_10, window_bounds = array<i64: 16, 1>}, {transform_indices = @transform_11, window_bounds = array<i64: 1, 16, 256>}]} {
    %c0 = arith.constant 0 : index
    %c0_0 = arith.constant 0 : index
    %c0_1 = arith.constant 0 : index
    %0 = vector.load %arg2[%c0, %c0_0, %c0_1] : memref<1x32x256xf32, #tpu.memory_space<vmem>>, vector<1x32x256xf32>
    %1 = vector.shape_cast %0 : vector<1x32x256xf32> to vector<32x256xf32>
    %c0_2 = arith.constant 0 : index
    %c0_3 = arith.constant 0 : index
    %2 = vector.load %arg3[%c0_2, %c0_3] : memref<32x32xbf16, #tpu.memory_space<vmem>>, vector<32x32xbf16>
    %3 = arith.truncf %1 : vector<32x256xf32> to vector<32x256xbf16>
    %cst = arith.constant dense<0.000000e+00> : vector<32x256xf32>
    %4 = tpu.matmul %2, %3, %cst {dimension_numbers = #tpu.dot_dimension_numbers<[1], [0], [0], [1], [0, 0, 1, 1], [], []>} : vector<32x32xbf16>, vector<32x256xbf16>, vector<32x256xf32> -> vector<32x256xf32>
    %c0_4 = arith.constant 0 : index
    %c0_5 = arith.constant 0 : index
    %5 = vector.load %arg4[%c0_4, %c0_5] : memref<32x1xf32, #tpu.memory_space<vmem>>, vector<32x1xf32>
    %6 = vector.broadcast %5 : vector<32x1xf32> to vector<32x256xf32>
    %7 = arith.addf %4, %6 : vector<32x256xf32>
    %cst_6 = arith.constant 0.000000e+00 : f32
    %8 = vector.broadcast %cst_6 : f32 to vector<32x256xf32>
    %9 = arith.cmpf oge, %7, %8 : vector<32x256xf32>
    %cst_7 = arith.constant 0.00999999977 : f32
    %10 = vector.broadcast %cst_7 : f32 to vector<32x256xf32>
    %11 = arith.mulf %10, %7 : vector<32x256xf32>
    %12 = arith.select %9, %7, %11 : vector<32x256xi1>, vector<32x256xf32>
    %13 = arith.addf %1, %12 : vector<32x256xf32>
    %c0_8 = arith.constant 0 : index
    %c0_9 = arith.constant 0 : index
    %14 = vector.load %arg5[%c0_8, %c0_9] : memref<32x32xbf16, #tpu.memory_space<vmem>>, vector<32x32xbf16>
    %15 = arith.truncf %13 : vector<32x256xf32> to vector<32x256xbf16>
    %cst_10 = arith.constant dense<0.000000e+00> : vector<32x256xf32>
    %16 = tpu.matmul %14, %15, %cst_10 {dimension_numbers = #tpu.dot_dimension_numbers<[1], [0], [0], [1], [0, 0, 1, 1], [], []>} : vector<32x32xbf16>, vector<32x256xbf16>, vector<32x256xf32> -> vector<32x256xf32>
    %c0_11 = arith.constant 0 : index
    %c0_12 = arith.constant 0 : index
    %17 = vector.load %arg6[%c0_11, %c0_12] : memref<32x1xf32, #tpu.memory_space<vmem>>, vector<32x1xf32>
    %18 = vector.broadcast %17 : vector<32x1xf32> to vector<32x256xf32>
    %19 = arith.addf %16, %18 : vector<32x256xf32>
    %cst_13 = arith.constant 0.000000e+00 : f32
    %20 = vector.broadcast %cst_13 : f32 to vector<32x256xf32>
    %21 = arith.cmpf oge, %19, %20 : vector<32x256xf32>
    %cst_14 = arith.constant 0.00999999977 : f32
    %22 = vector.broadcast %cst_14 : f32 to vector<32x256xf32>
    %23 = arith.mulf %22, %19 : vector<32x256xf32>
    %24 = arith.select %21, %19, %23 : vector<32x256xi1>, vector<32x256xf32>
    %25 = arith.addf %13, %24 : vector<32x256xf32>
    %c0_15 = arith.constant 0 : index
    %c0_16 = arith.constant 0 : index
    %26 = vector.load %arg7[%c0_15, %c0_16] : memref<32x32xbf16, #tpu.memory_space<vmem>>, vector<32x32xbf16>
    %27 = arith.truncf %25 : vector<32x256xf32> to vector<32x256xbf16>
    %cst_17 = arith.constant dense<0.000000e+00> : vector<32x256xf32>
    %28 = tpu.matmul %26, %27, %cst_17 {dimension_numbers = #tpu.dot_dimension_numbers<[1], [0], [0], [1], [0, 0, 1, 1], [], []>} : vector<32x32xbf16>, vector<32x256xbf16>, vector<32x256xf32> -> vector<32x256xf32>
    %c0_18 = arith.constant 0 : index
    %c0_19 = arith.constant 0 : index
    %29 = vector.load %arg8[%c0_18, %c0_19] : memref<32x1xf32, #tpu.memory_space<vmem>>, vector<32x1xf32>
    %30 = vector.broadcast %29 : vector<32x1xf32> to vector<32x256xf32>
    %31 = arith.addf %28, %30 : vector<32x256xf32>
    %cst_20 = arith.constant 0.000000e+00 : f32
    %32 = vector.broadcast %cst_20 : f32 to vector<32x256xf32>
    %33 = arith.cmpf oge, %31, %32 : vector<32x256xf32>
    %cst_21 = arith.constant 0.00999999977 : f32
    %34 = vector.broadcast %cst_21 : f32 to vector<32x256xf32>
    %35 = arith.mulf %34, %31 : vector<32x256xf32>
    %36 = arith.select %33, %31, %35 : vector<32x256xi1>, vector<32x256xf32>
    %37 = arith.addf %25, %36 : vector<32x256xf32>
    %c0_22 = arith.constant 0 : index
    %c0_23 = arith.constant 0 : index
    %38 = vector.load %arg9[%c0_22, %c0_23] : memref<32x32xbf16, #tpu.memory_space<vmem>>, vector<32x32xbf16>
    %39 = arith.truncf %37 : vector<32x256xf32> to vector<32x256xbf16>
    %cst_24 = arith.constant dense<0.000000e+00> : vector<32x256xf32>
    %40 = tpu.matmul %38, %39, %cst_24 {dimension_numbers = #tpu.dot_dimension_numbers<[1], [0], [0], [1], [0, 0, 1, 1], [], []>} : vector<32x32xbf16>, vector<32x256xbf16>, vector<32x256xf32> -> vector<32x256xf32>
    %c0_25 = arith.constant 0 : index
    %c0_26 = arith.constant 0 : index
    %41 = vector.load %arg10[%c0_25, %c0_26] : memref<32x1xf32, #tpu.memory_space<vmem>>, vector<32x1xf32>
    %42 = vector.broadcast %41 : vector<32x1xf32> to vector<32x256xf32>
    %43 = arith.addf %40, %42 : vector<32x256xf32>
    %cst_27 = arith.constant 0.000000e+00 : f32
    %44 = vector.broadcast %cst_27 : f32 to vector<32x256xf32>
    %45 = arith.cmpf oge, %43, %44 : vector<32x256xf32>
    %cst_28 = arith.constant 0.00999999977 : f32
    %46 = vector.broadcast %cst_28 : f32 to vector<32x256xf32>
    %47 = arith.mulf %46, %43 : vector<32x256xf32>
    %48 = arith.select %45, %43, %47 : vector<32x256xi1>, vector<32x256xf32>
    %49 = arith.addf %37, %48 : vector<32x256xf32>
    %c0_29 = arith.constant 0 : index
    %c0_30 = arith.constant 0 : index
    %50 = vector.load %arg11[%c0_29, %c0_30] : memref<16x32xbf16, #tpu.memory_space<vmem>>, vector<16x32xbf16>
    %51 = arith.truncf %49 : vector<32x256xf32> to vector<32x256xbf16>
    %cst_31 = arith.constant dense<0.000000e+00> : vector<16x256xf32>
    %52 = tpu.matmul %50, %51, %cst_31 {dimension_numbers = #tpu.dot_dimension_numbers<[1], [0], [0], [1], [0, 0, 1, 1], [], []>} : vector<16x32xbf16>, vector<32x256xbf16>, vector<16x256xf32> -> vector<16x256xf32>
    %c0_32 = arith.constant 0 : index
    %c0_33 = arith.constant 0 : index
    %53 = vector.load %arg12[%c0_32, %c0_33] : memref<16x1xf32, #tpu.memory_space<vmem>>, vector<16x1xf32>
    %54 = vector.broadcast %53 : vector<16x1xf32> to vector<16x256xf32>
    %55 = arith.addf %52, %54 : vector<16x256xf32>
    %c0_34 = arith.constant 0 : index
    %c0_35 = arith.constant 0 : index
    %c0_36 = arith.constant 0 : index
    %56 = vector.load %arg13[%c0_34, %c0_35, %c0_36] : memref<1x16x256xf32, #tpu.memory_space<vmem>>, vector<1x16x256xf32>
    %57 = vector.shape_cast %56 : vector<1x16x256xf32> to vector<16x256xf32>
    %58 = vector.shape_cast %55 : vector<16x256xf32> to vector<1x16x256xf32>
    tpu.vector_store %arg13[%c0_34, %c0_35, %c0_36], %58 {strides = array<i32>} : memref<1x16x256xf32, #tpu.memory_space<vmem>>, vector<1x16x256xf32>,
    return
  }
  func.func @transform_0(%arg0: i32, %arg1: i32) -> (i32, i32, i32) {
    %c0_i32 = arith.constant 0 : i32
    %c0_i32_0 = arith.constant 0 : i32
    return %arg0, %c0_i32, %arg1 : i32, i32, i32
  }
  func.func @transform_1(%arg0: i32, %arg1: i32) -> (i32, i32) {
    %c0_i32 = arith.constant 0 : i32
    %c0_i32_0 = arith.constant 0 : i32
    %c0_i32_1 = arith.constant 0 : i32
    return %c0_i32, %c0_i32_0 : i32, i32
  }
  func.func @transform_2(%arg0: i32, %arg1: i32) -> (i32, i32) {
    %c0_i32 = arith.constant 0 : i32
    %c0_i32_0 = arith.constant 0 : i32
    %c0_i32_1 = arith.constant 0 : i32
    return %c0_i32, %c0_i32_0 : i32, i32
  }
  func.func @transform_3(%arg0: i32, %arg1: i32) -> (i32, i32) {
    %c0_i32 = arith.constant 0 : i32
    %c0_i32_0 = arith.constant 0 : i32
    %c0_i32_1 = arith.constant 0 : i32
    return %c0_i32, %c0_i32_0 : i32, i32
  }
  func.func @transform_4(%arg0: i32, %arg1: i32) -> (i32, i32) {
    %c0_i32 = arith.constant 0 : i32
    %c0_i32_0 = arith.constant 0 : i32
    %c0_i32_1 = arith.constant 0 : i32
    return %c0_i32, %c0_i32_0 : i32, i32
  }
  func.func @transform_5(%arg0: i32, %arg1: i32) -> (i32, i32) {
    %c0_i32 = arith.constant 0 : i32
    %c0_i32_0 = arith.constant 0 : i32
    %c0_i32_1 = arith.constant 0 : i32
    return %c0_i32, %c0_i32_0 : i32, i32
  }
  func.func @transform_6(%arg0: i32, %arg1: i32) -> (i32, i32) {
    %c0_i32 = arith.constant 0 : i32
    %c0_i32_0 = arith.constant 0 : i32
    %c0_i32_1 = arith.constant 0 : i32
    return %c0_i32, %c0_i32_0 : i32, i32
  }
  func.func @transform_7(%arg0: i32, %arg1: i32) -> (i32, i32) {
    %c0_i32 = arith.constant 0 : i32
    %c0_i32_0 = arith.constant 0 : i32
    %c0_i32_1 = arith.constant 0 : i32
    return %c0_i32, %c0_i32_0 : i32, i32
  }
  func.func @transform_8(%arg0: i32, %arg1: i32) -> (i32, i32) {
    %c0_i32 = arith.constant 0 : i32
    %c0_i32_0 = arith.constant 0 : i32
    %c0_i32_1 = arith.constant 0 : i32
    return %c0_i32, %c0_i32_0 : i32, i32
  }
  func.func @transform_9(%arg0: i32, %arg1: i32) -> (i32, i32) {
    %c0_i32 = arith.constant 0 : i32
    %c0_i32_0 = arith.constant 0 : i32
    %c0_i32_1 = arith.constant 0 : i32
    return %c0_i32, %c0_i32_0 : i32, i32
  }
  func.func @transform_10(%arg0: i32, %arg1: i32) -> (i32, i32) {
    %c0_i32 = arith.constant 0 : i32
    %c0_i32_0 = arith.constant 0 : i32
    %c0_i32_1 = arith.constant 0 : i32
    return %c0_i32, %c0_i32_0 : i32, i32
  }
  func.func @transform_11(%arg0: i32, %arg1: i32) -> (i32, i32, i32) {
    %c0_i32 = arith.constant 0 : i32
    %c0_i32_0 = arith.constant 0 : i32
    return %arg0, %c0_i32, %arg1 : i32, i32, i32
  }
}

</mosaic_0001>

<bundles_post_ra>
// kernel: residual_dense_block_v2.1
= control target key start
LH: loop header
LB: loop body
LE: loop exit
PB: predicated region body
PF: predicated region fallthrough
CT: control target
= control target key end

     0   :  { %s1242_s17 = smov 0   ;;  %s1244_s18 = smov 0   ;;  %s1512_s0 = inlined_call_operand.vmem [shape: f32[2,32,256], index: 0, kind: input, shape index: {}]   ;;  %s1513_s1 = inlined_call_operand.vmem [shape: bf16[32,32], index: 1, kind: input, shape index: {}]   ;;  %s1514_s2 = inlined_call_operand.vmem [shape: f32[32,1], index: 2, kind: input, shape index: {}]   ;;  %s1515_s3 = inlined_call_operand.vmem [shape: bf16[32,32], index: 3, kind: input, shape index: {}]   ;;  %s1516_s4 = inlined_call_operand.vmem [shape: f32[32,1], index: 4, kind: input, shape index: {}]   ;;  %s1517_s5 = inlined_call_operand.vmem [shape: bf16[32,32], index: 5, kind: input, shape index: {}]   ;;  %s1518_s6 = inlined_call_operand.vmem [shape: f32[32,1], index: 6, kind: input, shape index: {}]   ;;  %s1519_s7 = inlined_call_operand.vmem [shape: bf16[32,32], index: 7, kind: input, shape index: {}]   ;;  %s1520_s8 = inlined_call_operand.vmem [shape: f32[32,1], index: 8, kind: input, shape index: {}]   ;;  %s1521_s9 = inlined_call_operand.vmem [shape: bf16[16,32], index: 9, kind: input, shape index: {}]   ;;  %s1522_s10 = inlined_call_operand.vmem [shape: f32[16,1], index: 10, kind: input, shape index: {}]   ;;  %s1523_s11 = inlined_call_operand.vmem [shape: f32[2,16,256], index: 11, kind: output, shape index: {}]  }
   0x1   :  { %s1246_s19 = smov 0  }
   0x2 LB: > { %s33_s20 = sadd.s32 1, %s1175_s18  ;;  %p1057_p0 = scmp.ge.s32.totalorder %s1179_s19, 1  ;;  %s1179_s19 = sphi %s1246_s19, %s21_s19   ;;  %s1175_s18 = sphi %s1244_s18, %s1525_s18   ;;  %s1171_s17 = sphi %s1242_s17, %s1524_s17  }
   0x3   : > { %p35_p1 = scmp.ge.s32.totalorder %s33_s20, 2  ;;  %p358_p2 = scmp.lt.s32.totalorder %s1179_s19, 3 }
   0x5   : > { %s1527_s20 = smov (%p35_p1, %s33_s20), 0  ;;  %p359_p3 = pnand %p1057_p0, %p358_p2 }
   0x6   : > { %p407_p4 = scmp.lt.s32.totalorder (!%p359_p3), %s1171_s17, 1 }
   0x7   : > { %362 = sbr.rel (%p359_p3) target bundleno = 840 (0x348), region = 64 }
   0xc   : > { %v445_v0 = vld [vmem:[%s1514_s2 + $0x10] sm:$0xff]  ;;  %v443_v1 = vld [vmem:[%s1514_s2] sm:$0xff]  ;;  %v1181_v2 = vmov 0   ;;  %s1529_s17 = smov (!%p407_p4, %s1171_s17), 1  ;;  %v446_v3 = vld [vmem:[%s1514_s2 + $0x18] sm:$0xff]  ;;  %vm477_vm0 = vcmask 261120  }
   0xd   : > { %1154 = vset.pattern.permute.xlu0 %v1181_v2  ;;  %1155 = vset.pattern.permute.xlu1 %v1181_v2  ;;  %s1118_s25 = sshll.u32 %s1529_s17, 6  ;;  %v444_v14 = vld [vmem:[%s1514_s2 + $0x8] sm:$0xff]  ;;  %v1120_v17 = vld [vmem:[%s1513_s1] sm:$0xff]  ;;  %v683_v20 = vld [vmem:[%s1518_s6 + $0x18] sm:$0xff]  ;;  %s1119_s15 = sshll.u32 %s1529_s17, 5 }
   0xe   : > { %459 = vperm.xlu0 %1154, %v445_v0   ;;  %449 = vperm.xlu1 %1155, %v443_v1   ;;  %s414_s28 = scalar_lea.vmem %s1512_s0, %s1118_s25  ;;  %v562_v18 = vld [vmem:[%s1516_s4] sm:$0xff]  ;;  %v563_v19 = vld [vmem:[%s1516_s4 + $0x8] sm:$0xff]  ;;  %v800_v23 = vld [vmem:[%s1520_s8 + $0x10] sm:$0xff]  ;;  %s424_s22 = scalar_lea.vmem %s1523_s11, %s1119_s15 }
   0xf   : > { %1156 = vset.pattern.permute.xlu2 %v1181_v2  ;;  %v1275_v4 = vld [vmem:[%s414_s28 + $0x20] sm:$0xff]  ;;  %v1277_v5 = vld [vmem:[%s414_s28 + $0x30] sm:$0xff]  ;;  %v1279_v6 = vld [vmem:[%s414_s28 + $0x28] sm:$0xff] }
  0x10   : > { %v441_v7 = vpack.c.bf16 %v1277_v5, %v1275_v4  ;;  %v1283_v8 = vld [vmem:[%s414_s28 + $0x38] sm:$0xff]  ;;  %v1285_v9 = vld [vmem:[%s414_s28] sm:$0xff]  ;;  %v1287_v10 = vld [vmem:[%s414_s28 + $0x10] sm:$0xff] }
  0x11   : > { %v442_v11 = vpack.c.bf16 %v1283_v8, %v1279_v6  ;;  %v1291_v12 = vld [vmem:[%s414_s28 + $0x8] sm:$0xff]  ;;  %v1293_v13 = vld [vmem:[%s414_s28 + $0x18] sm:$0xff]  ;;  %v439_v15 = vpack.c.bf16 %v1287_v10, %v1285_v9  ;;  %v680_v21 = vld [vmem:[%s1518_s6] sm:$0xff] }
  0x12   : > { %490 = vmatpush.bf16.msra.mxu0 %v441_v7  ;;  %v440_v16 = vpack.c.bf16 %v1293_v13, %v1291_v12  ;;  %v1121_v22 = vld [vmem:[%s1513_s1 + $0x8] sm:$0xff]  ;;  %v801_v24 = vld [vmem:[%s1520_s8 + $0x18] sm:$0xff]  ;;  %v914_v26 = vld [vmem:[%s1522_s10] sm:$0xff] }
  0x13   : > { %509 = vmatpush.bf16.msra.mxu1 %v442_v11  ;;  %v799_v25 = vld [vmem:[%s1520_s8 + $0x8] sm:$0xff]  ;;  %v564_v52 = vld [vmem:[%s1516_s4 + $0x10] sm:$0xff] }
  0x14   : > { %578 = vperm.xlu2 %1156, %v564_v52  }
  0x16   : > { %464 = vperm.xlu0 %1154, %v446_v3   ;;  %454 = vperm.xlu1 %1155, %v444_v14  }
  0x17   : > { %491 = vmatpush.bf16.msra.mxu0 %v439_v15  ;;  %510 = vmatpush.bf16.msra.mxu1 %v440_v16  ;;  %v1123_v16 = vld [vmem:[%s1515_s3 + $0x8] sm:$0xff] }
  0x1a   : > { %1070 = vmatmul.msk.bf16.vlgmr.msra.gmra.mxu0 %vm477_vm0, %v1120_v17  ;;  %1072 = vmatmul.msk.bf16.vlgmr.msra.gmra.mxu1 %vm477_vm0, %v1120_v17  ;;  %v798_v17 = vld [vmem:[%s1520_s8] sm:$0xff] }
  0x1e   : > { %568 = vperm.xlu0 %1154, %v562_v18   ;;  %573 = vperm.xlu1 %1155, %v563_v19   ;;  %v915_v18 = vld [vmem:[%s1522_s10 + $0x8] sm:$0xff] }
  0x26   : > { %701 = vperm.xlu0 %1154, %v683_v20   ;;  %686 = vperm.xlu1 %1155, %v680_v21  }
  0x2a   : > { %1071 = vmatmul.msk.bf16.gmra.mxu0 %vm477_vm0, %v1121_v22  ;;  %1073 = vmatmul.msk.bf16.gmra.mxu1 %vm477_vm0, %v1121_v22 }
  0x2e   : > { %814 = vperm.xlu0 %1154, %v800_v23   ;;  %819 = vperm.xlu1 %1155, %v801_v24  }
  0x36   : > { %809 = vperm.xlu0 %1154, %v799_v25   ;;  %918 = vperm.xlu1 %1155, %v914_v26  }
  0x6e   : > { %v579_v23 = vpop.permute.xlu2 %578 }
  0x80   : > { %v450_v31 = vpop.permute.xlu1 %449  ;;  %v460_v32 = vpop.permute.xlu0 %459 }
  0x88   : > { %v455_v36 = vpop.permute.xlu1 %454  ;;  %v465_v42 = vpop.permute.xlu0 %464 }
  0x97   : > { %v493_v27 = vpop.f32.mrf.mxu0  ;;  %v512_v28 = vpop.f32.mrf.mxu1 }
  0x98   : > { %v494_v38 = vadd.f32 %v493_v27, %v450_v31  ;;  %v513_v43 = vadd.f32 %v512_v28, %v450_v31  ;;  %v569_v27 = vpop.permute.xlu0 %568  ;;  %v574_v28 = vpop.permute.xlu1 %573 }
  0x9a   : > { %vm522_vm2 = vcmp.ge.f32.partialorder %v494_v38, 0.0  ;;  %v530_v49 = vmul.f32 0.01, %v494_v38  ;;  %v531_v55 = vmul.f32 0.01, %v513_v43  ;;  %vm523_vm8 = vcmp.ge.f32.partialorder %v513_v43, 0.0 }
  0x9c   : > { %v538_v2 = vsel %vm522_vm2, %v494_v38, %v530_v49 }
  0x9f   : > { %v495_v29 = vpop.f32.mrf.mxu0  ;;  %v514_v30 = vpop.f32.mrf.mxu1 }
  0xa0   : > { %v496_v39 = vadd.f32 %v495_v29, %v455_v36  ;;  %v515_v40 = vadd.f32 %v514_v30, %v455_v36 }
  0xa2   : > { %v532_v46 = vmul.f32 0.01, %v496_v39  ;;  %vm524_vm4 = vcmp.ge.f32.partialorder %v496_v39, 0.0  ;;  %v533_v50 = vmul.f32 0.01, %v515_v40  ;;  %vm525_vm5 = vcmp.ge.f32.partialorder %v515_v40, 0.0 }
  0xa4   : > { %v540_v59 = vsel %vm524_vm4, %v496_v39, %v532_v46  ;;  %v541_v63 = vsel %vm525_vm5, %v515_v40, %v533_v50 }
  0xa5   : > { %v1357_v7 = vadd.f32 %v540_v59, %v1287_v10  ;;  %v1365_v11 = vadd.f32 %v541_v63, %v1293_v13  ;;  %v1122_v13 = vld [vmem:[%s1515_s3] sm:$0xff] }
  0xa7   : > { %v498_v33 = vpop.f32.mrf.mxu0  ;;  %v517_v34 = vpop.f32.mrf.mxu1 }
  0xa8   : > { %v499_v35 = vadd.f32 %v498_v33, %v460_v32  ;;  %v518_v37 = vadd.f32 %v517_v34, %v460_v32 }
  0xaa   : > { %v534_v41 = vmul.f32 0.01, %v499_v35  ;;  %vm526_vm1 = vcmp.ge.f32.partialorder %v499_v35, 0.0  ;;  %v535_v44 = vmul.f32 0.01, %v518_v37  ;;  %vm527_vm3 = vcmp.ge.f32.partialorder %v518_v37, 0.0 }
  0xac   : > { %v542_v54 = vsel %vm526_vm1, %v499_v35, %v534_v41  ;;  %v543_v57 = vsel %vm527_vm3, %v518_v37, %v535_v44 }
  0xad   : > { %v1342_v60 = vadd.f32 %v542_v54, %v1275_v4  ;;  %v1348_v0 = vadd.f32 %v543_v57, %v1279_v6  ;;  %v539_v4 = vsel %vm523_vm8, %v513_v43, %v531_v55 }
  0xae   : > { %v1371_v14 = vadd.f32 %v539_v4, %v1291_v12  ;;  %v681_v12 = vld [vmem:[%s1518_s6 + $0x8] sm:$0xff] }
  0xaf   : > { %v500_v45 = vpop.f32.mrf.mxu0  ;;  %v519_v48 = vpop.f32.mrf.mxu1 }
  0xb0   : > { %v501_v47 = vadd.f32 %v500_v45, %v465_v42  ;;  %v520_v51 = vadd.f32 %v519_v48, %v465_v42  ;;  %v559_v15 = vpack.c.bf16 %v1365_v11, %v1371_v14 }
  0xb2   : > { %vm528_vm6 = vcmp.ge.f32.partialorder %v501_v47, 0.0  ;;  %v536_v53 = vmul.f32 0.01, %v501_v47  ;;  %vm529_vm7 = vcmp.ge.f32.partialorder %v520_v51, 0.0  ;;  %v537_v56 = vmul.f32 0.01, %v520_v51 }
  0xb4   : > { %v544_v58 = vsel %vm528_vm6, %v501_v47, %v536_v53  ;;  %v545_v62 = vsel %vm529_vm7, %v520_v51, %v537_v56 }
  0xb5   : > { %v1345_v61 = vadd.f32 %v544_v58, %v1277_v5  ;;  %v1351_v1 = vadd.f32 %v545_v62, %v1283_v8  ;;  %v565_v5 = vld [vmem:[%s1516_s4 + $0x18] sm:$0xff]  ;;  %v1368_v8 = vadd.f32 %v538_v2, %v1285_v9  ;;  %v682_v9 = vld [vmem:[%s1518_s6 + $0x10] sm:$0xff] }
  0xb6   : > { %583 = vperm.xlu2 %1156, %v565_v5  }
  0xb7   : > { %v560_v3 = vpack.c.bf16 %v1345_v61, %v1342_v60  ;;  %v561_v6 = vpack.c.bf16 %v1351_v1, %v1348_v0  ;;  %v558_v10 = vpack.c.bf16 %v1357_v7, %v1368_v8 }
  0xb9   : > { %608 = vmatpush.bf16.msra.mxu2 %v560_v3  ;;  %627 = vmatpush.bf16.msra.mxu3 %v561_v6  ;;  %v1124_v3 = vld [vmem:[%s1517_s5] sm:$0xff] }
  0xbd   : > { %609 = vmatpush.bf16.msra.mxu2 %v558_v10  ;;  %628 = vmatpush.bf16.msra.mxu3 %v559_v15 }
  0xbe   : > { %696 = vperm.xlu2 %1156, %v682_v9  }
  0xc0   : > { %1082 = vmatmul.msk.bf16.vlgmr.msra.gmra.mxu2 %vm477_vm0, %v1122_v13  ;;  %1084 = vmatmul.msk.bf16.vlgmr.msra.gmra.mxu3 %vm477_vm0, %v1122_v13  ;;  %v687_v13 = vpop.permute.xlu1 %686 }
  0xc6   : > { %691 = vperm.xlu2 %1156, %v681_v12  }
  0xce   : > { %804 = vperm.xlu2 %1156, %v798_v17  }
  0xd0   : > { %1083 = vmatmul.msk.bf16.gmra.mxu2 %vm477_vm0, %v1123_v16  ;;  %1085 = vmatmul.msk.bf16.gmra.mxu3 %vm477_vm0, %v1123_v16 }
  0xd6   : > { %923 = vperm.xlu2 %1156, %v915_v18  }
 0x110   : > { %v584_v34 = vpop.permute.xlu2 %583 }
 0x143   : > { %v611_v19 = vpop.f32.mrf.mxu2  ;;  %v630_v20 = vpop.f32.mrf.mxu3 }
 0x144   : > { %v612_v30 = vadd.f32 %v611_v19, %v569_v27  ;;  %v631_v35 = vadd.f32 %v630_v20, %v569_v27  ;;  %v702_v20 = vpop.permute.xlu0 %701 }
 0x146   : > { %vm640_vm10 = vcmp.ge.f32.partialorder %v612_v30, 0.0  ;;  %v648_v41 = vmul.f32 0.01, %v612_v30  ;;  %v649_v46 = vmul.f32 0.01, %v631_v35  ;;  %vm641_vm1 = vcmp.ge.f32.partialorder %v631_v35, 0.0 }
 0x148   : > { %v656_v57 = vsel %vm640_vm10, %v612_v30, %v648_v41 }
 0x149   : > { %v1423_v63 = vadd.f32 %v656_v57, %v1368_v8  ;;  %v697_v8 = vpop.permute.xlu2 %696 }
 0x14b   : > { %v613_v21 = vpop.f32.mrf.mxu2  ;;  %v632_v22 = vpop.f32.mrf.mxu3 }
 0x14c   : > { %v614_v31 = vadd.f32 %v613_v21, %v574_v28  ;;  %v633_v32 = vadd.f32 %v632_v22, %v574_v28 }
 0x14e   : > { %v650_v38 = vmul.f32 0.01, %v614_v31  ;;  %vm642_vm12 = vcmp.ge.f32.partialorder %v614_v31, 0.0  ;;  %v651_v42 = vmul.f32 0.01, %v633_v32  ;;  %vm643_vm13 = vcmp.ge.f32.partialorder %v633_v32, 0.0 }
 0x150   : > { %v658_v50 = vsel %vm642_vm12, %v614_v31, %v650_v38  ;;  %v659_v54 = vsel %vm643_vm13, %v633_v32, %v651_v42 }
 0x151   : > { %v1415_v59 = vadd.f32 %v658_v50, %v1357_v7  ;;  %v1420_v62 = vadd.f32 %v659_v54, %v1365_v11  ;;  %v1125_v7 = vld [vmem:[%s1517_s5 + $0x8] sm:$0xff]  ;;  %v692_v9 = vpop.permute.xlu2 %691 }
 0x152   : > { %v1127_v54 = vld [vmem:[%s1519_s7 + $0x8] sm:$0xff] }
 0x153   : > { %v616_v24 = vpop.f32.mrf.mxu2  ;;  %v635_v25 = vpop.f32.mrf.mxu3 }
 0x154   : > { %v617_v26 = vadd.f32 %v616_v24, %v579_v23  ;;  %v636_v29 = vadd.f32 %v635_v25, %v579_v23 }
 0x156   : > { %v652_v33 = vmul.f32 0.01, %v617_v26  ;;  %vm644_vm9 = vcmp.ge.f32.partialorder %v617_v26, 0.0  ;;  %v653_v36 = vmul.f32 0.01, %v636_v29  ;;  %vm645_vm11 = vcmp.ge.f32.partialorder %v636_v29, 0.0 }
 0x158   : > { %v660_v45 = vsel %vm644_vm9, %v617_v26, %v652_v33  ;;  %v661_v48 = vsel %vm645_vm11, %v636_v29, %v653_v36 }
 0x159   : > { %v1400_v51 = vadd.f32 %v660_v45, %v1342_v60  ;;  %v1406_v55 = vadd.f32 %v661_v48, %v1348_v0  ;;  %v657_v60 = vsel %vm641_vm1, %v631_v35, %v649_v46 }
 0x15a   : > { %v1426_v0 = vadd.f32 %v657_v60, %v1371_v14 }
 0x15b   : > { %v618_v37 = vpop.f32.mrf.mxu2  ;;  %v637_v40 = vpop.f32.mrf.mxu3 }
 0x15c   : > { %v619_v39 = vadd.f32 %v618_v37, %v584_v34  ;;  %v638_v43 = vadd.f32 %v637_v40, %v584_v34  ;;  %v677_v2 = vpack.c.bf16 %v1420_v62, %v1426_v0 }
 0x15e   : > { %vm646_vm14 = vcmp.ge.f32.partialorder %v619_v39, 0.0  ;;  %v654_v44 = vmul.f32 0.01, %v619_v39  ;;  %vm647_vm15 = vcmp.ge.f32.partialorder %v638_v43, 0.0  ;;  %v655_v47 = vmul.f32 0.01, %v638_v43 }
 0x160   : > { %v662_v49 = vsel %vm646_vm14, %v619_v39, %v654_v44  ;;  %v663_v53 = vsel %vm647_vm15, %v638_v43, %v655_v47 }
 0x161   : > { %v1403_v52 = vadd.f32 %v662_v49, %v1345_v61  ;;  %v1409_v56 = vadd.f32 %v663_v53, %v1351_v1  ;;  %v676_v1 = vpack.c.bf16 %v1415_v59, %v1423_v63  ;;  %v1126_v53 = vld [vmem:[%s1519_s7] sm:$0xff] }
 0x163   : > { %v678_v58 = vpack.c.bf16 %v1403_v52, %v1400_v51  ;;  %v679_v61 = vpack.c.bf16 %v1409_v56, %v1406_v55 }
 0x165   : > { %726 = vmatpush.bf16.msrb.mxu0 %v678_v58  ;;  %745 = vmatpush.bf16.msrb.mxu1 %v679_v61 }
 0x169   : > { %727 = vmatpush.bf16.msrb.mxu0 %v676_v1  ;;  %746 = vmatpush.bf16.msrb.mxu1 %v677_v2 }
 0x16c   : > { %1094 = vmatmul.msk.bf16.vlgmr.msrb.gmra.mxu0 %vm477_vm0, %v1124_v3  ;;  %1096 = vmatmul.msk.bf16.vlgmr.msrb.gmra.mxu1 %vm477_vm0, %v1124_v3 }
 0x17c   : > { %1095 = vmatmul.msk.bf16.gmra.mxu0 %vm477_vm0, %v1125_v7  ;;  %1097 = vmatmul.msk.bf16.gmra.mxu1 %vm477_vm0, %v1125_v7 }
 0x1e9   : > { %v729_v4 = vpop.f32.mrf.mxu0  ;;  %v748_v5 = vpop.f32.mrf.mxu1 }
 0x1ea   : > { %v730_v16 = vadd.f32 %v729_v4, %v687_v13  ;;  %v749_v21 = vadd.f32 %v748_v5, %v687_v13  ;;  %v820_v5 = vpop.permute.xlu1 %819 }
 0x1ec   : > { %vm758_vm3 = vcmp.ge.f32.partialorder %v730_v16, 0.0  ;;  %v766_v27 = vmul.f32 0.01, %v730_v16  ;;  %v767_v32 = vmul.f32 0.01, %v749_v21  ;;  %vm759_vm9 = vcmp.ge.f32.partialorder %v749_v21, 0.0 }
 0x1ee   : > { %v774_v43 = vsel %vm758_vm3, %v730_v16, %v766_v27  ;;  %v775_v46 = vsel %vm759_vm9, %v749_v21, %v767_v32 }
 0x1ef   : > { %v1466_v49 = vadd.f32 %v774_v43, %v1423_v63  ;;  %v1469_v50 = vadd.f32 %v775_v46, %v1426_v0  ;;  %v805_v0 = vpop.permute.xlu2 %804 }
 0x1f1   : > { %v731_v6 = vpop.f32.mrf.mxu0  ;;  %v750_v11 = vpop.f32.mrf.mxu1 }
 0x1f2   : > { %v732_v17 = vadd.f32 %v731_v6, %v692_v9  ;;  %v751_v18 = vadd.f32 %v750_v11, %v692_v9 }
 0x1f4   : > { %v768_v24 = vmul.f32 0.01, %v732_v17  ;;  %vm760_vm5 = vcmp.ge.f32.partialorder %v732_v17, 0.0  ;;  %v769_v28 = vmul.f32 0.01, %v751_v18  ;;  %vm761_vm6 = vcmp.ge.f32.partialorder %v751_v18, 0.0 }
 0x1f6   : > { %v776_v36 = vsel %vm760_vm5, %v732_v17, %v768_v24  ;;  %v777_v40 = vsel %vm761_vm6, %v751_v18, %v769_v28 }
 0x1f7   : > { %v1458_v45 = vadd.f32 %v776_v36, %v1415_v59  ;;  %v1463_v48 = vadd.f32 %v777_v40, %v1420_v62  ;;  %v815_v59 = vpop.permute.xlu0 %814  ;;  %v919_v40 = vpop.permute.xlu1 %918 }
 0x1f9   : > { %v734_v14 = vpop.f32.mrf.mxu0  ;;  %v753_v10 = vpop.f32.mrf.mxu1 }
 0x1fa   : > { %v735_v15 = vadd.f32 %v734_v14, %v697_v8  ;;  %v754_v12 = vadd.f32 %v753_v10, %v697_v8 }
 0x1fc   : > { %v770_v19 = vmul.f32 0.01, %v735_v15  ;;  %vm762_vm2 = vcmp.ge.f32.partialorder %v735_v15, 0.0  ;;  %v771_v22 = vmul.f32 0.01, %v754_v12  ;;  %vm763_vm4 = vcmp.ge.f32.partialorder %v754_v12, 0.0 }
 0x1fe   : > { %v778_v31 = vsel %vm762_vm2, %v735_v15, %v770_v19  ;;  %v779_v34 = vsel %vm763_vm4, %v754_v12, %v771_v22 }
 0x1ff   : > { %v1443_v37 = vadd.f32 %v778_v31, %v1400_v51  ;;  %v1449_v41 = vadd.f32 %v779_v34, %v1406_v55  ;;  %v794_v51 = vpack.c.bf16 %v1458_v45, %v1466_v49  ;;  %v810_v63 = vpop.permute.xlu0 %809 }
 0x201   : > { %v736_v23 = vpop.f32.mrf.mxu0  ;;  %v755_v26 = vpop.f32.mrf.mxu1 }
 0x202   : > { %v737_v25 = vadd.f32 %v736_v23, %v702_v20  ;;  %v756_v29 = vadd.f32 %v755_v26, %v702_v20 }
 0x204   : > { %vm764_vm7 = vcmp.ge.f32.partialorder %v737_v25, 0.0  ;;  %v772_v30 = vmul.f32 0.01, %v737_v25  ;;  %vm765_vm8 = vcmp.ge.f32.partialorder %v756_v29, 0.0  ;;  %v773_v33 = vmul.f32 0.01, %v756_v29 }
 0x206   : > { %v780_v35 = vsel %vm764_vm7, %v737_v25, %v772_v30  ;;  %v781_v39 = vsel %vm765_vm8, %v756_v29, %v773_v33 }
 0x207   : > { %v1446_v38 = vadd.f32 %v780_v35, %v1403_v52  ;;  %v1452_v42 = vadd.f32 %v781_v39, %v1409_v56  ;;  %v795_v52 = vpack.c.bf16 %v1463_v48, %v1469_v50  ;;  %v1128_v39 = vld [vmem:[%s1521_s9] sm:$0xff] }
 0x209   : > { %v796_v44 = vpack.c.bf16 %v1446_v38, %v1443_v37  ;;  %v797_v47 = vpack.c.bf16 %v1452_v42, %v1449_v41 }
 0x20b   : > { %844 = vmatpush.bf16.msrb.mxu2 %v796_v44  ;;  %863 = vmatpush.bf16.msrb.mxu3 %v797_v47 }
 0x20f   : > { %845 = vmatpush.bf16.msrb.mxu2 %v794_v51  ;;  %864 = vmatpush.bf16.msrb.mxu3 %v795_v52 }
 0x212   : > { %1106 = vmatmul.msk.bf16.vlgmr.msrb.gmra.mxu2 %vm477_vm0, %v1126_v53  ;;  %1108 = vmatmul.msk.bf16.vlgmr.msrb.gmra.mxu3 %vm477_vm0, %v1126_v53 }
 0x222   : > { %1107 = vmatmul.msk.bf16.gmra.mxu2 %vm477_vm0, %v1127_v54  ;;  %1109 = vmatmul.msk.bf16.gmra.mxu3 %vm477_vm0, %v1127_v54 }
 0x295   : > { %v847_v55 = vpop.f32.mrf.mxu2  ;;  %v866_v56 = vpop.f32.mrf.mxu3 }
 0x296   : > { %v848_v2 = vadd.f32 %v847_v55, %v805_v0  ;;  %v867_v6 = vadd.f32 %v866_v56, %v805_v0 }
 0x298   : > { %vm876_vm11 = vcmp.ge.f32.partialorder %v848_v2, 0.0  ;;  %v884_v13 = vmul.f32 0.01, %v848_v2  ;;  %v885_v18 = vmul.f32 0.01, %v867_v6  ;;  %vm877_vm2 = vcmp.ge.f32.partialorder %v867_v6, 0.0 }
 0x29a   : > { %v892_v27 = vsel %vm876_vm11, %v848_v2, %v884_v13  ;;  %v893_v30 = vsel %vm877_vm2, %v867_v6, %v885_v18 }
 0x29b   : > { %v900_v35 = vadd.f32 %v892_v27, %v1466_v49  ;;  %v901_v36 = vadd.f32 %v893_v30, %v1469_v50 }
 0x29d   : > { %v849_v57 = vpop.f32.mrf.mxu2  ;;  %v868_v58 = vpop.f32.mrf.mxu3 }
 0x29e   : > { %v850_v3 = vadd.f32 %v849_v57, %v810_v63  ;;  %v869_v7 = vadd.f32 %v868_v58, %v810_v63 }
 0x2a0   : > { %v886_v14 = vmul.f32 0.01, %v850_v3  ;;  %vm878_vm13 = vcmp.ge.f32.partialorder %v850_v3, 0.0  ;;  %v887_v9 = vmul.f32 0.01, %v869_v7  ;;  %vm879_vm14 = vcmp.ge.f32.partialorder %v869_v7, 0.0 }
 0x2a2   : > { %v894_v21 = vsel %vm878_vm13, %v850_v3, %v886_v14  ;;  %v895_v23 = vsel %vm879_vm14, %v869_v7, %v887_v9 }
 0x2a3   : > { %v902_v32 = vadd.f32 %v894_v21, %v1458_v45  ;;  %v903_v34 = vadd.f32 %v895_v23, %v1463_v48  ;;  %v924_v45 = vpop.permute.xlu2 %923 }
 0x2a5   : > { %v852_v60 = vpop.f32.mrf.mxu2  ;;  %v871_v61 = vpop.f32.mrf.mxu3 }
 0x2a6   : > { %v853_v62 = vadd.f32 %v852_v60, %v815_v59  ;;  %v872_v1 = vadd.f32 %v871_v61, %v815_v59 }
 0x2a8   : > { %v888_v4 = vmul.f32 0.01, %v853_v62  ;;  %vm880_vm10 = vcmp.ge.f32.partialorder %v853_v62, 0.0  ;;  %v889_v11 = vmul.f32 0.01, %v872_v1  ;;  %vm881_vm12 = vcmp.ge.f32.partialorder %v872_v1, 0.0 }
 0x2aa   : > { %v896_v16 = vsel %vm880_vm10, %v853_v62, %v888_v4  ;;  %v897_v19 = vsel %vm881_vm12, %v872_v1, %v889_v11 }
 0x2ab   : > { %v904_v24 = vadd.f32 %v896_v16, %v1443_v37  ;;  %v905_v28 = vadd.f32 %v897_v19, %v1449_v41  ;;  %v910_v37 = vpack.c.bf16 %v902_v32, %v900_v35 }
 0x2ad   : > { %v854_v8 = vpop.f32.mrf.mxu2  ;;  %v873_v15 = vpop.f32.mrf.mxu3 }
 0x2ae   : > { %v855_v10 = vadd.f32 %v854_v8, %v820_v5  ;;  %v874_v12 = vadd.f32 %v873_v15, %v820_v5 }
 0x2b0   : > { %vm882_vm15 = vcmp.ge.f32.partialorder %v855_v10, 0.0  ;;  %v890_v17 = vmul.f32 0.01, %v855_v10  ;;  %vm883_vm1 = vcmp.ge.f32.partialorder %v874_v12, 0.0  ;;  %v891_v20 = vmul.f32 0.01, %v874_v12 }
 0x2b2   : > { %v898_v22 = vsel %vm882_vm15, %v855_v10, %v890_v17  ;;  %v899_v26 = vsel %vm883_vm1, %v874_v12, %v891_v20 }
 0x2b3   : > { %v906_v25 = vadd.f32 %v898_v22, %v1446_v38  ;;  %v907_v29 = vadd.f32 %v899_v26, %v1452_v42  ;;  %v911_v38 = vpack.c.bf16 %v903_v34, %v901_v36 }
 0x2b5   : > { %v912_v31 = vpack.c.bf16 %v906_v25, %v904_v24  ;;  %v913_v33 = vpack.c.bf16 %v907_v29, %v905_v28 }
 0x2b7   : > { %940 = vmatpush.bf16.msra.mxu0 %v912_v31  ;;  %954 = vmatpush.bf16.msra.mxu1 %v913_v33 }
 0x2bb   : > { %941 = vmatpush.bf16.msra.mxu0 %v910_v37  ;;  %955 = vmatpush.bf16.msra.mxu1 %v911_v38 }
 0x2be   : > { %1114 = vmatmul.msk.bf16.vlgmr.msra.gmra.mxu0 %vm477_vm0, %v1128_v39  ;;  %1115 = vmatmul.msk.bf16.vlgmr.msra.gmra.mxu1 %vm477_vm0, %v1128_v39 }
 0x33b   : > { %v943_v41 = vpop.f32.mrf.mxu0  ;;  %v957_v43 = vpop.f32.mrf.mxu1 }
 0x33c   : > { %v944_v42 = vadd.f32 %v943_v41, %v919_v40  ;;  %v958_v44 = vadd.f32 %v957_v43, %v919_v40 }
 0x33e   : > { %962 = vst [vmem:[%s424_s22] sm:$0xff] %v944_v42 }
 0x33f   : > { %963 = vst [vmem:[%s424_s22 + $0x8] sm:$0xff] %v958_v44 }
 0x343   : > { %v945_v46 = vpop.f32.mrf.mxu0  ;;  %v959_v48 = vpop.f32.mrf.mxu1 }
 0x344   : > { %v946_v47 = vadd.f32 %v945_v46, %v924_v45  ;;  %v960_v49 = vadd.f32 %v959_v48, %v924_v45 }
 0x346   : > { %964 = vst [vmem:[%s424_s22 + $0x10] sm:$0xff] %v946_v47 }
 0x347   : > { %965 = vst [vmem:[%s424_s22 + $0x18] sm:$0xff] %v960_v49 }
 0x348 PF: > { %s21_s19 = sadd.s32 1, %s1179_s19   ;;  %s1524_s17 = smov %s1175_s18 }
 0x349   : > { %p18_p5 = scmp.ge.s32.totalorder %s21_s19, 4   ;;  %s1525_s18 = smov %s1527_s20 }
 0x34b   :  { %20 = sbr.rel (!%p18_p5) target bundleno = 2 (0x2), region = 94 }

</bundles_post_ra>
